<compile_context>
chip_gen: v5e
topology: v5e:2x2
jax: 0.10.0
libtpu: 0.0.40
codegen_flags: <defaults>
</compile_context>

<pallas_src>
import jax
import jax.numpy as jnp
from jax.experimental import pallas as pl
from jax.experimental.pallas import tpu as pltpu

LEAKY_SLOPE = 0.01      # nn.LeakyReLU() default negative_slope
LANE = 128              # TPU lane width; out_layer columns padded to this
SUBLANE = 8
VMEM_BUDGET = 12 << 20  # conservative working-set budget (default scoped VMEM >= 16MiB)


def _leaky_relu(x):
    # slope in (0,1): max(x, slope*x) == LeakyReLU(x); cheaper than where(cmp, ...)
    return jnp.maximum(x, LEAKY_SLOPE * x)


def _round_up(n, m):
    return ((n + m - 1) // m) * m


def qnetwork_kernel(obs_ref,
                    w_in_ref, b_in_ref,
                    w_m0_ref, b_m0_ref,
                    w_m1_ref, b_m1_ref,
                    w_out_ref, b_out_ref,
                    out_ref):
    """One (TB, state_dim) batch tile -> (TB, LANE-padded) Q-values.

    MXU matmuls run in the weight dtype (bf16 by default) with f32 accumulation;
    bias add + LeakyReLU run in f32 on the VPU.
    """
    x = obs_ref[...].astype(w_in_ref.dtype)

    # in_layer + activation
    x = jnp.dot(x, w_in_ref[...], preferred_element_type=jnp.float32) + b_in_ref[...]
    x = _leaky_relu(x)

    # mid_layers[0] + activation
    x = jnp.dot(x.astype(w_m0_ref.dtype), w_m0_ref[...],
                preferred_element_type=jnp.float32) + b_m0_ref[...]
    x = _leaky_relu(x)

    # mid_layers[1] + activation
    x = jnp.dot(x.astype(w_m1_ref.dtype), w_m1_ref[...],
                preferred_element_type=jnp.float32) + b_m1_ref[...]
    x = _leaky_relu(x)

    # out_layer: scale already folded into w_out/b_out; columns padded to LANE so
    # this store is lane-dense (full 128-lane vst).
    q = jnp.dot(x.astype(w_out_ref.dtype), w_out_ref[...],
                preferred_element_type=jnp.float32) + b_out_ref[...]
    out_ref[...] = q


def init_qnetwork_params(key, state_dim, hidden_dim, action_dim):
    """Deterministic init matching PyTorch nn.Linear shapes.

    PyTorch stores weight as [out, in]; we store the transpose [in, out] so the
    kernel computes x @ W + b directly on the MXU.  Biases are [1, out].
    Uses uniform(-1/sqrt(fan_in), 1/sqrt(fan_in)) like torch's default Linear init.
    """
    def linear(k, fan_in, fan_out):
        kw, kb = jax.random.split(k)
        bound = 1.0 / jnp.sqrt(jnp.float32(fan_in))
        w = jax.random.uniform(kw, (fan_in, fan_out), jnp.float32, -bound, bound)
        b = jax.random.uniform(kb, (1, fan_out), jnp.float32, -bound, bound)
        return w, b

    k_in, k_m0, k_m1, k_out = jax.random.split(key, 4)
    w_in, b_in = linear(k_in, state_dim, hidden_dim)
    w_m0, b_m0 = linear(k_m0, hidden_dim, hidden_dim)
    w_m1, b_m1 = linear(k_m1, hidden_dim, hidden_dim)
    w_out, b_out = linear(k_out, hidden_dim, action_dim)
    return dict(w_in=w_in, b_in=b_in, w_m0=w_m0, b_m0=b_m0,
                w_m1=w_m1, b_m1=b_m1, w_out=w_out, b_out=b_out)


def pack_params_for_kernel(params, *, scale=1.0, weight_dtype=jnp.bfloat16):
    """One-time parameter transform for the kernel.

    - folds `scale` (only if > 1, matching the PyTorch branch) into w_out / b_out,
    - zero-pads out_layer columns to a multiple of 128 lanes (lane-dense final store),
    - casts weights to `weight_dtype` (bf16 halves HBM/VMEM traffic, native MXU path);
      biases stay f32 so the epilogue (bias + LeakyReLU) runs in f32.
    """
    action_dim = params["w_out"].shape[1]
    out_pad = max(LANE, _round_up(action_dim, LANE))
    s = jnp.float32(scale) if scale > 1 else jnp.float32(1.0)
    w_out = jnp.pad(params["w_out"] * s, ((0, 0), (0, out_pad - action_dim)))
    b_out = jnp.pad(params["b_out"] * s, ((0, 0), (0, out_pad - action_dim)))
    return dict(
        w_in=params["w_in"].astype(weight_dtype), b_in=params["b_in"].astype(jnp.float32),
        w_m0=params["w_m0"].astype(weight_dtype), b_m0=params["b_m0"].astype(jnp.float32),
        w_m1=params["w_m1"].astype(weight_dtype), b_m1=params["b_m1"].astype(jnp.float32),
        w_out=w_out.astype(weight_dtype), b_out=b_out.astype(jnp.float32),
    )


def _pick_batch_tile(batch, state_dim, hidden_dim, out_pad, weight_bytes,
                     block_batch):
    """Largest multiple-of-8 batch tile that keeps the working set within VMEM budget."""
    # Resident weights/biases (assume the pipeline double-buffers them too -> x2).
    w_bytes = 2 * weight_bytes * (state_dim * hidden_dim
                                  + 2 * hidden_dim * hidden_dim
                                  + hidden_dim * out_pad)
    w_bytes += 2 * 4 * (3 * hidden_dim + out_pad)
    # Per-row cost: obs + out tiles double-buffered, plus ~3 live f32 activation rows.
    per_row = 2 * 4 * (state_dim + out_pad) + 3 * 4 * max(hidden_dim, LANE)
    avail = max(VMEM_BUDGET - w_bytes, per_row * SUBLANE)
    tb_cap = max(SUBLANE, (avail // per_row) // SUBLANE * SUBLANE)
    tb = min(block_batch, tb_cap, _round_up(batch, SUBLANE))
    return _round_up(tb, SUBLANE)


def qnetwork_forward(observation, packed, *, action_dim, block_batch=512):
    """Pallas-backed QNetwork.forward (dueling=False, hidden_layers=2, LeakyReLU)."""
    obs = jnp.asarray(observation, jnp.float32)
    batch, state_dim = obs.shape
    hidden_dim = packed["w_in"].shape[1]
    out_pad = packed["w_out"].shape[1]
    weight_bytes = jnp.dtype(packed["w_in"].dtype).itemsize

    tb = _pick_batch_tile(batch, state_dim, hidden_dim, out_pad, weight_bytes,
                          block_batch)
    padded_batch = _round_up(batch, tb)
    if padded_batch != batch:
        obs = jnp.pad(obs, ((0, padded_batch - batch), (0, 0)))
    n_tiles = padded_batch // tb

    const = lambda i: (0, 0)  # weights/biases: same block every step -> stay resident

    flops = 2 * padded_batch * (state_dim * hidden_dim
                                + 2 * hidden_dim * hidden_dim
                                + hidden_dim * out_pad)
    bytes_accessed = (padded_batch * (state_dim + out_pad) * 4
                      + weight_bytes * (state_dim * hidden_dim
                                        + 2 * hidden_dim * hidden_dim
                                        + hidden_dim * out_pad))

    out = pl.pallas_call(
        qnetwork_kernel,
        out_shape=jax.ShapeDtypeStruct((padded_batch, out_pad), jnp.float32),
        grid=(n_tiles,),
        in_specs=[
            pl.BlockSpec((tb, state_dim), lambda i: (i, 0)),
            pl.BlockSpec((state_dim, hidden_dim), const),
            pl.BlockSpec((1, hidden_dim), const),
            pl.BlockSpec((hidden_dim, hidden_dim), const),
            pl.BlockSpec((1, hidden_dim), const),
            pl.BlockSpec((hidden_dim, hidden_dim), const),
            pl.BlockSpec((1, hidden_dim), const),
            pl.BlockSpec((hidden_dim, out_pad), const),
            pl.BlockSpec((1, out_pad), const),
        ],
        out_specs=pl.BlockSpec((tb, out_pad), lambda i: (i, 0)),
        compiler_params=pltpu.CompilerParams(
            dimension_semantics=("parallel",)),
        cost_estimate=pl.CostEstimate(flops=flops, transcendentals=0,
                                      bytes_accessed=bytes_accessed),
    )(obs,
      packed["w_in"], packed["b_in"],
      packed["w_m0"], packed["b_m0"],
      packed["w_m1"], packed["b_m1"],
      packed["w_out"], packed["b_out"])
    return out[:batch, :action_dim]


def qnetwork_ref_f32(observation, params, *, scale=1.0):
    """Pure-f32 PyTorch-semantics reference."""
    x = _leaky_relu(observation @ params["w_in"] + params["b_in"])
    x = _leaky_relu(x @ params["w_m0"] + params["b_m0"])
    x = _leaky_relu(x @ params["w_m1"] + params["b_m1"])
    q = x @ params["w_out"] + params["b_out"]
    if scale > 1:
        q = q * scale
    return q


def qnetwork_ref_packed(observation, packed, *, action_dim):
    """Reference that mimics the kernel numerics (bf16 matmul operands, f32 acc)."""
    wdt = packed["w_in"].dtype

    def dense(x, w, b):
        return jnp.dot(x.astype(wdt), w, preferred_element_type=jnp.float32) + b

    x = jnp.asarray(observation, jnp.float32)
    x = _leaky_relu(dense(x, packed["w_in"], packed["b_in"]))
    x = _leaky_relu(dense(x, packed["w_m0"], packed["b_m0"]))
    x = _leaky_relu(dense(x, packed["w_m1"], packed["b_m1"]))
    q = dense(x, packed["w_out"], packed["b_out"])
    return q[:, :action_dim]


if __name__ == "__main__":
    STATE_DIM, HIDDEN_DIM, ACTION_DIM, BATCH = 16, 32, 4, 8
    SCALE = 1.0  # module default; values > 1 are folded into w_out/b_out at pack time

    key = jax.random.PRNGKey(0)
    k_params, k_obs = jax.random.split(key)
    params = init_qnetwork_params(k_params, STATE_DIM, HIDDEN_DIM, ACTION_DIM)
    packed = pack_params_for_kernel(params, scale=SCALE, weight_dtype=jnp.bfloat16)
    obs = jax.random.normal(k_obs, (BATCH, STATE_DIM), jnp.float32)

    out = qnetwork_forward(obs, packed, action_dim=ACTION_DIM)
    out = jax.block_until_ready(out)
    assert out.shape == (BATCH, ACTION_DIM)

    # Tight check vs. a reference with identical numerics (bf16 operands, f32 acc).
    ref_packed = qnetwork_ref_packed(obs, packed, action_dim=ACTION_DIM)
    assert jnp.allclose(out, ref_packed, atol=1e-4, rtol=1e-4), "kernel != packed ref"

    # Loose check vs. the pure-f32 PyTorch-semantics reference (bf16 drift only).
    ref_f32 = qnetwork_ref_f32(obs, params, scale=SCALE)
    assert jnp.allclose(out, ref_f32, atol=5e-2, rtol=5e-2), "kernel != f32 ref"

    print("KERNEL_OK")
</pallas_src>

<mosaic_0001>
module attributes {stable_mosaic.version = 11 : i64} {
  func.func @qnetwork_kernel(%arg0: i32, %arg1: memref<8x16xf32, #tpu.memory_space<vmem>>, %arg2: memref<16x32xbf16, #tpu.memory_space<vmem>>, %arg3: memref<1x32xf32, #tpu.memory_space<vmem>>, %arg4: memref<32x32xbf16, #tpu.memory_space<vmem>>, %arg5: memref<1x32xf32, #tpu.memory_space<vmem>>, %arg6: memref<32x32xbf16, #tpu.memory_space<vmem>>, %arg7: memref<1x32xf32, #tpu.memory_space<vmem>>, %arg8: memref<32x128xbf16, #tpu.memory_space<vmem>>, %arg9: memref<1x128xf32, #tpu.memory_space<vmem>>, %arg10: memref<8x128xf32, #tpu.memory_space<vmem>>) attributes {dimension_semantics = [#tpu.dimension_semantics<parallel>], iteration_bounds = array<i64: 1>, scalar_prefetch = 0 : i64, scratch_operands = 0 : i64, tpu.core_type = #tpu.core_type<tc>, window_params = [{transform_indices = @transform_0, window_bounds = array<i64: 8, 16>}, {pipeline_mode = #tpu.pipeline_mode<synchronous>, transform_indices = @transform_1, window_bounds = array<i64: 16, 32>}, {pipeline_mode = #tpu.pipeline_mode<synchronous>, transform_indices = @transform_2, window_bounds = array<i64: 1, 32>}, {pipeline_mode = #tpu.pipeline_mode<synchronous>, transform_indices = @transform_3, window_bounds = array<i64: 32, 32>}, {pipeline_mode = #tpu.pipeline_mode<synchronous>, transform_indices = @transform_4, window_bounds = array<i64: 1, 32>}, {pipeline_mode = #tpu.pipeline_mode<synchronous>, transform_indices = @transform_5, window_bounds = array<i64: 32, 32>}, {pipeline_mode = #tpu.pipeline_mode<synchronous>, transform_indices = @transform_6, window_bounds = array<i64: 1, 32>}, {pipeline_mode = #tpu.pipeline_mode<synchronous>, transform_indices = @transform_7, window_bounds = array<i64: 32, 128>}, {pipeline_mode = #tpu.pipeline_mode<synchronous>, transform_indices = @transform_8, window_bounds = array<i64: 1, 128>}, {transform_indices = @transform_9, window_bounds = array<i64: 8, 128>}]} {
    %c0 = arith.constant 0 : index
    %c0_0 = arith.constant 0 : index
    %0 = vector.load %arg1[%c0, %c0_0] : memref<8x16xf32, #tpu.memory_space<vmem>>, vector<8x16xf32>
    %1 = arith.truncf %0 : vector<8x16xf32> to vector<8x16xbf16>
    %c0_1 = arith.constant 0 : index
    %c0_2 = arith.constant 0 : index
    %2 = vector.load %arg2[%c0_1, %c0_2] : memref<16x32xbf16, #tpu.memory_space<vmem>>, vector<16x32xbf16>
    %cst = arith.constant dense<0.000000e+00> : vector<8x32xf32>
    %3 = tpu.matmul %1, %2, %cst {dimension_numbers = #tpu.dot_dimension_numbers<[1], [0], [0], [1], [0, 0, 1, 1], [], []>} : vector<8x16xbf16>, vector<16x32xbf16>, vector<8x32xf32> -> vector<8x32xf32>
    %c0_3 = arith.constant 0 : index
    %c0_4 = arith.constant 0 : index
    %4 = vector.load %arg3[%c0_3, %c0_4] : memref<1x32xf32, #tpu.memory_space<vmem>>, vector<1x32xf32>
    %5 = vector.broadcast %4 : vector<1x32xf32> to vector<8x32xf32>
    %6 = arith.addf %3, %5 : vector<8x32xf32>
    %cst_5 = arith.constant 0.00999999977 : f32
    %7 = vector.broadcast %cst_5 : f32 to vector<8x32xf32>
    %8 = arith.mulf %7, %6 : vector<8x32xf32>
    %9 = arith.maximumf %6, %8 : vector<8x32xf32>
    %10 = arith.truncf %9 : vector<8x32xf32> to vector<8x32xbf16>
    %c0_6 = arith.constant 0 : index
    %c0_7 = arith.constant 0 : index
    %11 = vector.load %arg4[%c0_6, %c0_7] : memref<32x32xbf16, #tpu.memory_space<vmem>>, vector<32x32xbf16>
    %cst_8 = arith.constant dense<0.000000e+00> : vector<8x32xf32>
    %12 = tpu.matmul %10, %11, %cst_8 {dimension_numbers = #tpu.dot_dimension_numbers<[1], [0], [0], [1], [0, 0, 1, 1], [], []>} : vector<8x32xbf16>, vector<32x32xbf16>, vector<8x32xf32> -> vector<8x32xf32>
    %c0_9 = arith.constant 0 : index
    %c0_10 = arith.constant 0 : index
    %13 = vector.load %arg5[%c0_9, %c0_10] : memref<1x32xf32, #tpu.memory_space<vmem>>, vector<1x32xf32>
    %14 = vector.broadcast %13 : vector<1x32xf32> to vector<8x32xf32>
    %15 = arith.addf %12, %14 : vector<8x32xf32>
    %cst_11 = arith.constant 0.00999999977 : f32
    %16 = vector.broadcast %cst_11 : f32 to vector<8x32xf32>
    %17 = arith.mulf %16, %15 : vector<8x32xf32>
    %18 = arith.maximumf %15, %17 : vector<8x32xf32>
    %19 = arith.truncf %18 : vector<8x32xf32> to vector<8x32xbf16>
    %c0_12 = arith.constant 0 : index
    %c0_13 = arith.constant 0 : index
    %20 = vector.load %arg6[%c0_12, %c0_13] : memref<32x32xbf16, #tpu.memory_space<vmem>>, vector<32x32xbf16>
    %cst_14 = arith.constant dense<0.000000e+00> : vector<8x32xf32>
    %21 = tpu.matmul %19, %20, %cst_14 {dimension_numbers = #tpu.dot_dimension_numbers<[1], [0], [0], [1], [0, 0, 1, 1], [], []>} : vector<8x32xbf16>, vector<32x32xbf16>, vector<8x32xf32> -> vector<8x32xf32>
    %c0_15 = arith.constant 0 : index
    %c0_16 = arith.constant 0 : index
    %22 = vector.load %arg7[%c0_15, %c0_16] : memref<1x32xf32, #tpu.memory_space<vmem>>, vector<1x32xf32>
    %23 = vector.broadcast %22 : vector<1x32xf32> to vector<8x32xf32>
    %24 = arith.addf %21, %23 : vector<8x32xf32>
    %cst_17 = arith.constant 0.00999999977 : f32
    %25 = vector.broadcast %cst_17 : f32 to vector<8x32xf32>
    %26 = arith.mulf %25, %24 : vector<8x32xf32>
    %27 = arith.maximumf %24, %26 : vector<8x32xf32>
    %28 = arith.truncf %27 : vector<8x32xf32> to vector<8x32xbf16>
    %c0_18 = arith.constant 0 : index
    %c0_19 = arith.constant 0 : index
    %29 = vector.load %arg8[%c0_18, %c0_19] : memref<32x128xbf16, #tpu.memory_space<vmem>>, vector<32x128xbf16>
    %cst_20 = arith.constant dense<0.000000e+00> : vector<8x128xf32>
    %30 = tpu.matmul %28, %29, %cst_20 {dimension_numbers = #tpu.dot_dimension_numbers<[1], [0], [0], [1], [0, 0, 1, 1], [], []>} : vector<8x32xbf16>, vector<32x128xbf16>, vector<8x128xf32> -> vector<8x128xf32>
    %c0_21 = arith.constant 0 : index
    %c0_22 = arith.constant 0 : index
    %31 = vector.load %arg9[%c0_21, %c0_22] : memref<1x128xf32, #tpu.memory_space<vmem>>, vector<1x128xf32>
    %32 = vector.broadcast %31 : vector<1x128xf32> to vector<8x128xf32>
    %33 = arith.addf %30, %32 : vector<8x128xf32>
    %c0_23 = arith.constant 0 : index
    %c0_24 = arith.constant 0 : index
    %34 = vector.load %arg10[%c0_23, %c0_24] : memref<8x128xf32, #tpu.memory_space<vmem>>, vector<8x128xf32>
    tpu.vector_store %arg10[%c0_23, %c0_24], %33 {strides = array<i32>} : memref<8x128xf32, #tpu.memory_space<vmem>>, vector<8x128xf32>,
    return
  }
  func.func @transform_0(%arg0: i32) -> (i32, i32) {
    %c0_i32 = arith.constant 0 : i32
    %c0_i32_0 = arith.constant 0 : i32
    return %arg0, %c0_i32 : i32, i32
  }
  func.func @transform_1(%arg0: i32) -> (i32, i32) {
    %c0_i32 = arith.constant 0 : i32
    %c0_i32_0 = arith.constant 0 : i32
    %c0_i32_1 = arith.constant 0 : i32
    return %c0_i32, %c0_i32_0 : i32, i32
  }
  func.func @transform_2(%arg0: i32) -> (i32, i32) {
    %c0_i32 = arith.constant 0 : i32
    %c0_i32_0 = arith.constant 0 : i32
    %c0_i32_1 = arith.constant 0 : i32
    return %c0_i32, %c0_i32_0 : i32, i32
  }
  func.func @transform_3(%arg0: i32) -> (i32, i32) {
    %c0_i32 = arith.constant 0 : i32
    %c0_i32_0 = arith.constant 0 : i32
    %c0_i32_1 = arith.constant 0 : i32
    return %c0_i32, %c0_i32_0 : i32, i32
  }
  func.func @transform_4(%arg0: i32) -> (i32, i32) {
    %c0_i32 = arith.constant 0 : i32
    %c0_i32_0 = arith.constant 0 : i32
    %c0_i32_1 = arith.constant 0 : i32
    return %c0_i32, %c0_i32_0 : i32, i32
  }
  func.func @transform_5(%arg0: i32) -> (i32, i32) {
    %c0_i32 = arith.constant 0 : i32
    %c0_i32_0 = arith.constant 0 : i32
    %c0_i32_1 = arith.constant 0 : i32
    return %c0_i32, %c0_i32_0 : i32, i32
  }
  func.func @transform_6(%arg0: i32) -> (i32, i32) {
    %c0_i32 = arith.constant 0 : i32
    %c0_i32_0 = arith.constant 0 : i32
    %c0_i32_1 = arith.constant 0 : i32
    return %c0_i32, %c0_i32_0 : i32, i32
  }
  func.func @transform_7(%arg0: i32) -> (i32, i32) {
    %c0_i32 = arith.constant 0 : i32
    %c0_i32_0 = arith.constant 0 : i32
    %c0_i32_1 = arith.constant 0 : i32
    return %c0_i32, %c0_i32_0 : i32, i32
  }
  func.func @transform_8(%arg0: i32) -> (i32, i32) {
    %c0_i32 = arith.constant 0 : i32
    %c0_i32_0 = arith.constant 0 : i32
    %c0_i32_1 = arith.constant 0 : i32
    return %c0_i32, %c0_i32_0 : i32, i32
  }
  func.func @transform_9(%arg0: i32) -> (i32, i32) {
    %c0_i32 = arith.constant 0 : i32
    %c0_i32_0 = arith.constant 0 : i32
    return %arg0, %c0_i32 : i32, i32
  }
}

</mosaic_0001>

<bundles_post_ra>
// kernel: tpu_custom_call.1
= control target key start
LH: loop header
LB: loop body
LE: loop exit
PB: predicated region body
PF: predicated region fallthrough
CT: control target
= control target key end

     0   :  { %14 = vsyncpa [#allocation3], 0  ;;  %s573_s0 = inlined_call_operand.hbm [shape: f32[8,16], index: 0, kind: input, shape index: {}]   ;;  %s574_s1 = inlined_call_operand.hbm [shape: bf16[16,32], index: 1, kind: input, shape index: {}]   ;;  %s575_s2 = inlined_call_operand.vmem [shape: f32[1,32], index: 2, kind: input, shape index: {}]   ;;  %s576_s3 = inlined_call_operand.hbm [shape: bf16[32,32], index: 3, kind: input, shape index: {}]   ;;  %s577_s4 = inlined_call_operand.vmem [shape: f32[1,32], index: 4, kind: input, shape index: {}]   ;;  %s578_s5 = inlined_call_operand.hbm [shape: bf16[32,32], index: 5, kind: input, shape index: {}]   ;;  %s579_s6 = inlined_call_operand.vmem [shape: f32[1,32], index: 6, kind: input, shape index: {}]   ;;  %s580_s7 = inlined_call_operand.hbm [shape: bf16[32,128], index: 7, kind: input, shape index: {}]   ;;  %s581_s8 = inlined_call_operand.vmem [shape: f32[1,128], index: 8, kind: input, shape index: {}]   ;;  %s582_s9 = inlined_call_operand.hbm [shape: f32[8,128], index: 9, kind: output, shape index: {}]  }
   0x1   :  { %15 = vsyncpa [#allocation6], 0 }
   0x2   :  { %16 = vsyncpa [#allocation9], 0  ;;  %s33_s11 = sshll.u32 %s574_s1, 4  ;;  %s34_s11 = int_to_ptr.hbm [resolvable:$true] %s33_s11 }
   0x3   :  { %17 = vsyncpa [#allocation4], 0  ;;  %s482_s12 = smov [#allocation5]   ;;  %s63_s16 = sshll.u32 %s578_s5, 4  ;;  %s64_s16 = int_to_ptr.hbm [resolvable:$true] %s63_s16 }
   0x4   :  { %s35_s13 = sshll.u32 %s482_s12, 4  ;;  %s483_s17 = smov 64   ;;  %s36_s13 = int_to_ptr.vmem [resolvable:$true] %s35_s13 }
   0x5   :  { %s484_s18 = smov 4   ;;  %s485_s19 = smov [#allocation8]  }
   0x6   :  { %41 = dma.hbm_to_vmem [thread:$0]  %s34_s11, 128, %s36_s13, [#allocation6], %s483_s17, %s483_s17, %s484_s18  }
   0x7   :  { %s65_s20 = sshll.u32 %s485_s19, 4  ;;  %s23_s23 = sshll.u32 %s573_s0, 4  ;;  %s66_s20 = int_to_ptr.vmem [resolvable:$true] %s65_s20  ;;  %s24_s23 = int_to_ptr.hbm [resolvable:$true] %s23_s23 }
   0x8   :  { %71 = dma.hbm_to_vmem [thread:$0]  %s64_s16, 256, %s66_s20, [#allocation9], %s483_s17, %s483_s17, %s484_s18  }
   0x9   :  { %s48_s25 = sshll.u32 %s576_s3, 4  ;;  %s486_s26 = smov [#allocation2]   ;;  %s49_s25 = int_to_ptr.hbm [resolvable:$true] %s48_s25 }
   0xa   :  { %s25_s27 = sshll.u32 %s486_s26, 4  ;;  %s487_s5 = smov [#allocation7]   ;;  %s26_s27 = int_to_ptr.vmem [resolvable:$true] %s25_s27 }
   0xb   :  { %28 = dma.hbm_to_vmem [thread:$0]  %s24_s23, 128, %s26_s27, [#allocation3]  }
   0xc   :  { %s50_s28 = sshll.u32 %s487_s5, 4  ;;  %s78_s10 = sshll.u32 %s580_s7, 4  ;;  %s51_s28 = int_to_ptr.vmem [resolvable:$true] %s50_s28  ;;  %s79_s10 = int_to_ptr.hbm [resolvable:$true] %s78_s10 }
   0xd   :  { %56 = dma.hbm_to_vmem [thread:$0]  %s49_s25, 256, %s51_s28, [#allocation6], %s483_s17, %s483_s17, %s484_s18  }
   0xe   :  { %s488_s0 = smov [#allocation10]  }
   0xf   :  { %s80_s11 = sshll.u32 %s488_s0, 4  ;;  %s81_s11 = int_to_ptr.vmem [resolvable:$true] %s80_s11 }
  0x10   :  { %86 = dma.hbm_to_vmem [thread:$0]  %s79_s10, 256, %s81_s11, [#allocation9], %s483_s17, %s483_s17, %s484_s18  }
  0x11   :  { %474 = dma.done.wait [#allocation3], 128  }
  0x12   :  { %475 = vsyncadd [#allocation3], 4294967168 }
  0x13   :  { %476 = dma.done.wait [#allocation6], 384  }
  0x14   :  { %477 = vsyncadd [#allocation6], 4294966912 }
  0x15   :  { %478 = dma.done.wait [#allocation9], 512  }
  0x16   :  { %479 = vsyncadd [#allocation9], 4294966784  ;;  %v311_v0 = vld [vmem:[#allocation5] sm:$0xff]  ;;  %v110_v1 = vld [vmem:[#allocation2] sm:$0xff]  ;;  %vm124_vm0 = vcmask 130048   ;;  %vm164_vm1 = vcmask 261120  }
  0x17   :  { %v111_v2 = vpack.c.bf16 %v110_v1, %v110_v1  ;;  %135 = vmatpush.bf16.msra.mxu0 %v311_v0  ;;  %v313_v3 = vld [vmem:[#allocation7 + $0x8] sm:$0xff]  ;;  %v312_v4 = vld [vmem:[#allocation7] sm:$0xff]  ;;  %v326_v5 = vld [vmem:[%s575_s2] ss:$0 sm:$0xff]  ;;  %s489_s16 = smov [#allocation11]   ;;  %s267_s20 = sshll.u32 %s582_s9, 4  ;;  %s268_s20 = int_to_ptr.hbm [resolvable:$true] %s267_s20 }
  0x18   :  { %174 = vmatpush.bf16.msra.mxu1 %v313_v3  ;;  %v315_v12 = vld [vmem:[#allocation8 + $0x8] sm:$0xff]  ;;  %v314_v13 = vld [vmem:[#allocation8] sm:$0xff]  ;;  %v317_v21 = vld [vmem:[#allocation10 + $0x8] sm:$0xff]  ;;  %s265_s17 = sshll.u32 %s489_s16, 4  ;;  %s266_s17 = int_to_ptr.vmem [resolvable:$true] %s265_s17 }
  0x19   :  { %213 = vmatpush.bf16.msra.mxu2 %v315_v12  ;;  %v327_v14 = vld [vmem:[%s577_s4] ss:$0 sm:$0xff]  ;;  %252 = vmatpush.bf16.msra.mxu3 %v317_v21  ;;  %v316_v22 = vld [vmem:[#allocation10] sm:$0xff] }
  0x1a   :  { %283 = vmatmul.msk.bf16.vlgmr.msra.gmra.mxu0 %vm124_vm0, %v111_v2  ;;  %v328_v23 = vld [vmem:[%s579_s6] ss:$0 sm:$0xff] }
  0x1b   :  { %v329_v30 = vld [vmem:[%s581_s8] ss:$0 sm:$0xff] }
  0x1c   :  { %175 = vmatpush.bf16.msra.mxu1 %v312_v4 }
  0x1d   :  { %214 = vmatpush.bf16.msra.mxu2 %v314_v13  ;;  %253 = vmatpush.bf16.msra.mxu3 %v316_v22 }
  0x97   :  { %v137_v6 = vpop.f32.mrf.mxu0 }
  0x98   :  { %v138_v7 = vadd.f32 %v326_v5, %v137_v6 }
  0x9a   :  { %v141_v8 = vmul.f32 0.01, %v138_v7 }
  0x9c   :  { %v142_v9 = vmax.f32 %v138_v7, %v141_v8 }
  0x9e   :  { %v143_v10 = vpack.c.bf16 %v142_v9, %v142_v9 }
  0x9f   :  { %v139_v11 = vpop.f32.mrf.mxu0 }
  0xa0   :  { %292 = vmatmul.msk.bf16.vlgmr.msra.gmra.mxu1 %vm164_vm1, %v143_v10 }
 0x11d   :  { %v177_v15 = vpop.f32.mrf.mxu1 }
 0x11e   :  { %v178_v16 = vadd.f32 %v327_v14, %v177_v15 }
 0x120   :  { %v181_v17 = vmul.f32 0.01, %v178_v16 }
 0x122   :  { %v182_v18 = vmax.f32 %v178_v16, %v181_v17 }
 0x124   :  { %v183_v19 = vpack.c.bf16 %v182_v18, %v182_v18 }
 0x125   :  { %v179_v20 = vpop.f32.mrf.mxu1 }
 0x126   :  { %301 = vmatmul.msk.bf16.vlgmr.msra.gmra.mxu2 %vm164_vm1, %v183_v19 }
 0x1a9   :  { %v216_v24 = vpop.f32.mrf.mxu2 }
 0x1aa   :  { %v217_v25 = vadd.f32 %v328_v23, %v216_v24 }
 0x1ac   :  { %v220_v26 = vmul.f32 0.01, %v217_v25 }
 0x1ae   :  { %v221_v27 = vmax.f32 %v217_v25, %v220_v26 }
 0x1b0   :  { %v222_v28 = vpack.c.bf16 %v221_v27, %v221_v27 }
 0x1b1   :  { %v218_v29 = vpop.f32.mrf.mxu2 }
 0x1b2   :  { %310 = vmatmul.msk.bf16.vlgmr.msra.gmra.mxu3 %vm164_vm1, %v222_v28 }
 0x235   :  { %v255_v31 = vpop.f32.mrf.mxu3 }
 0x236   :  { %v256_v32 = vadd.f32 %v329_v30, %v255_v31 }
 0x238   :  { %259 = vst [vmem:[#allocation11] sm:$0xff] %v256_v32 }
 0x239   :  { %270 = dma.vmem_to_hbm [thread:$0]  %s266_s17, 128, %s268_s20, [#allocation4]  }
 0x23d   :  { %v257_v33 = vpop.f32.mrf.mxu3 }
 0x23e   :  { %480 = dma.done.wait [#allocation4], 128  }
 0x23f   :  { %481 = vsyncadd [#allocation4], 4294967168 }
 0x240   :  { %275 = vsyncpa [#allocation3], 1 }
 0x241   :  { %276 = vsyncpa [#allocation6], 1 }
 0x242   :  { %277 = vsyncpa [#allocation9], 1 }
 0x243   :  { %278 = vsyncpa [#allocation4], 1 }

</bundles_post_ra>
